<compile_context>
chip_gen: v7x
topology: tpu7x:2x2x1
jax: 0.10.0
libtpu: 0.0.40
codegen_flags: <defaults>
</compile_context>

<pallas_src>
import math

import jax
import jax.numpy as jnp
from jax.experimental import pallas as pl
from jax.experimental.pallas import tpu as pltpu

_SQRT_2 = math.sqrt(2.0)


def _gelu_exact(x):
    # Matches the PyTorch reference: x * 0.5 * (1 + erf(x / sqrt(2)))
    # (If a compute-bound bf16 config turns out VALU-bound on the erf
    #  polynomial, jax.nn.gelu(approximate=True) moves the work to the EUP.)
    return x * 0.5 * (1.0 + jax.lax.erf(x / _SQRT_2))


def roberta_intermediate_kernel(x_ref, w_ref, b_ref, o_ref):
    # x_ref: (tm, H); w_ref: (tn, H) in PyTorch (I, H) layout; b_ref: (1, tn);
    # o_ref: (tm, tn).  Contract on H (x @ W^T); accumulate in f32.
    acc = jax.lax.dot_general(
        x_ref[...], w_ref[...],
        dimension_numbers=(((1,), (1,)), ((), ())),   # contract on H
        preferred_element_type=jnp.float32,
    )
    acc = acc + b_ref[...].astype(jnp.float32)
    o_ref[...] = _gelu_exact(acc).astype(o_ref.dtype)


def _round_up(x, m):
    return ((x + m - 1) // m) * m


def _vmem_budget():
    """(vmem_limit_bytes, planning_budget) derived from the actual chip."""
    try:
        cap = int(getattr(pltpu.get_tpu_info(), "vmem_capacity_bytes", 0))
    except Exception:
        cap = 0
    if cap <= 0:
        cap = 64 << 20                      # conservative: v7x per-TC size
    vmem_limit = min(cap - (4 << 20), 100 << 20)   # 60 MiB on v7x, 100 MiB v5e/v6e
    budget = vmem_limit - (4 << 20)                # headroom for compiler scratch
    return vmem_limit, budget


def roberta_intermediate(hidden_states, weight, bias, *, tm=512,
                         compute_dtype=None, out_dtype=None):
    """RobertaIntermediate forward: gelu(hidden_states @ weight.T + bias).

    hidden_states: (B, S, H); weight: (I, H) [PyTorch nn.Linear layout];
    bias: (I,).  Returns (B, S, I) in `out_dtype` (default: input dtype).
    """
    B, S, H = hidden_states.shape
    I, H_w = weight.shape
    assert H_w == H, "weight must be (intermediate_size, hidden_size)"
    M = B * S

    if out_dtype is None:
        out_dtype = hidden_states.dtype

    x2d = hidden_states.reshape(M, H)
    b2d = bias.reshape(1, I)

    if compute_dtype is not None:
        # bf16 MXU operands roughly halve x/W HBM reads; accumulation, bias add
        # and gelu remain f32 in the kernel.  Callers should cache the weight
        # in compute_dtype so this cast is a no-op across calls.
        x2d = x2d.astype(compute_dtype)
        weight = weight.astype(compute_dtype)

    x_b = jnp.dtype(x2d.dtype).itemsize
    w_b = jnp.dtype(weight.dtype).itemsize
    o_b = jnp.dtype(out_dtype).itemsize
    bias_b = jnp.dtype(b2d.dtype).itemsize

    align_m = 16 if min(x_b, o_b) == 2 else 8
    vmem_limit, budget = _vmem_budget()

    # ---------------- Plan A: weight fully VMEM-resident, 1-D grid over M ----
    def resident_need(t):
        return (2 * I * H * w_b          # double-buffered resident weight
                + 2 * t * H * x_b        # streamed x tiles
                + 2 * t * I * o_b        # streamed output tiles
                + 2 * I * bias_b)        # bias strip

    tm_cap = max(align_m, min(_round_up(tm, align_m), _round_up(M, align_m)))
    tm_eff = None
    t = tm_cap
    while t >= align_m:
        if resident_need(t) <= budget:
            tm_eff = t
            break
        t -= align_m

    if tm_eff is not None:
        M_pad = _round_up(M, tm_eff)
        if M_pad != M:
            x2d = jnp.pad(x2d, ((0, M_pad - M), (0, 0)))
        I_pad = I
        grid = (M_pad // tm_eff,)
        in_specs = [
            # x tile changes along the grid -> streamed / double-buffered.
            pl.BlockSpec((tm_eff, H), lambda i: (i, 0)),
            # weight + bias block index constant -> DMA'd once, reused.
            pl.BlockSpec((I, H), lambda i: (0, 0)),
            pl.BlockSpec((1, I), lambda i: (0, 0)),
        ]
        out_specs = pl.BlockSpec((tm_eff, I), lambda i: (i, 0))
        semantics = ("parallel",)
        x_reads, w_reads = 1, 1
    else:
        # ------------- Plan B: 2-D grid; pick streamed operand analytically --
        tn = min(512, _round_up(I, 128))
        t = max(align_m, min(_round_up(tm, align_m), _round_up(M, align_m)))

        def need(t_, n_):
            return (2 * n_ * H * w_b + 2 * t_ * H * x_b
                    + 2 * t_ * n_ * o_b + 2 * n_ * bias_b)

        while need(t, tn) > budget and (t > align_m or tn > 128):
            if tn >= t and tn > 128:
                tn -= 128
            elif t > align_m:
                t -= align_m
            else:
                tn -= 128
        if need(t, tn) > budget:
            raise ValueError("RobertaIntermediate: minimal tiles exceed VMEM budget")
        tm_eff = t

        M_pad = _round_up(M, tm_eff)
        I_pad = _round_up(I, tn)
        if M_pad != M:
            x2d = jnp.pad(x2d, ((0, M_pad - M), (0, 0)))
        if I_pad != I:
            weight = jnp.pad(weight, ((0, I_pad - I), (0, 0)))
            b2d = jnp.pad(b2d, ((0, 0), (0, I_pad - I)))

        m_grid = M_pad // tm_eff
        n_grid = I_pad // tn
        x_extra = M_pad * H * x_b * (n_grid - 1)   # order A re-reads x
        w_extra = I_pad * H * w_b * (m_grid - 1)   # order B re-reads W
        if x_extra <= w_extra:
            # (N outer, M inner): weight strip reused across all M tiles.
            grid = (n_grid, m_grid)
            in_specs = [
                pl.BlockSpec((tm_eff, H), lambda j, i: (i, 0)),
                pl.BlockSpec((tn, H), lambda j, i: (j, 0)),
                pl.BlockSpec((1, tn), lambda j, i: (0, j)),
            ]
            out_specs = pl.BlockSpec((tm_eff, tn), lambda j, i: (i, j))
            x_reads, w_reads = n_grid, 1
        else:
            # (M outer, N inner): x tile reused across all N strips.
            grid = (m_grid, n_grid)
            in_specs = [
                pl.BlockSpec((tm_eff, H), lambda i, j: (i, 0)),
                pl.BlockSpec((tn, H), lambda i, j: (j, 0)),
                pl.BlockSpec((1, tn), lambda i, j: (0, j)),
            ]
            out_specs = pl.BlockSpec((tm_eff, tn), lambda i, j: (i, j))
            x_reads, w_reads = 1, m_grid
        semantics = ("parallel", "parallel")

    cost = pl.CostEstimate(
        flops=2 * M_pad * H * I_pad,
        transcendentals=0,   # exact erf lowers to a VPU polynomial, not EUP
        bytes_accessed=(x_reads * M_pad * H * x_b
                        + w_reads * I_pad * H * w_b
                        + I_pad * bias_b
                        + M_pad * I_pad * o_b),
    )

    out = pl.pallas_call(
        roberta_intermediate_kernel,
        out_shape=jax.ShapeDtypeStruct((M_pad, I_pad), out_dtype),
        grid_spec=pltpu.PrefetchScalarGridSpec(
            num_scalar_prefetch=0,
            grid=grid,
            in_specs=in_specs,
            out_specs=out_specs,
        ),
        compiler_params=pltpu.CompilerParams(
            dimension_semantics=semantics,
            vmem_limit_bytes=vmem_limit,
        ),
        cost_estimate=cost,
    )(x2d, weight, b2d)

    out = out[:M, :I]
    return out.reshape(B, S, I)


def _reference(hidden_states, weight, bias):
    y = (hidden_states.astype(jnp.float32) @ weight.astype(jnp.float32).T
         + bias.astype(jnp.float32))
    return y * 0.5 * (1.0 + jax.lax.erf(y / _SQRT_2))


if __name__ == "__main__":
    key = jax.random.PRNGKey(0)
    keys = jax.random.split(key, 9)

    # --- 1) Small config consistent with the module (hidden=32, intermediate=64).
    B, S, H, I = 2, 8, 32, 64
    x = jax.random.normal(keys[0], (B, S, H), dtype=jnp.float32)
    w = jax.random.normal(keys[1], (I, H), dtype=jnp.float32) * 0.02
    b = jax.random.normal(keys[2], (I,), dtype=jnp.float32) * 0.02
    out = roberta_intermediate(x, w, b)
    jax.block_until_ready(out)
    ref = _reference(x, w, b)
    assert out.shape == (B, S, I)
    assert jnp.allclose(out, ref, atol=1e-5, rtol=1e-5), "mismatch (small f32)"

    # --- 2) Larger shape, multi-step 1-D grid (tm=128 -> 4 steps), f32.
    B2, S2, H2, I2 = 4, 128, 256, 1024
    x2 = jax.random.normal(keys[3], (B2, S2, H2), dtype=jnp.float32)
    w2 = jax.random.normal(keys[4], (I2, H2), dtype=jnp.float32) * 0.02
    b2 = jax.random.normal(keys[5], (I2,), dtype=jnp.float32) * 0.02
    out2 = roberta_intermediate(x2, w2, b2, tm=128)
    jax.block_until_ready(out2)
    ref2 = _reference(x2, w2, b2)
    assert jnp.allclose(out2, ref2, atol=1e-3, rtol=1e-3), "mismatch (tiled f32)"

    # --- 3) Ragged M (padding path) + bf16 MXU operands + bf16 output.
    B3, S3, H3, I3 = 2, 5, 64, 256
    x3 = jax.random.normal(keys[6], (B3, S3, H3), dtype=jnp.float32)
    w3 = jax.random.normal(keys[7], (I3, H3), dtype=jnp.float32) * 0.02
    b3 = jax.random.normal(keys[8], (I3,), dtype=jnp.float32) * 0.02
    out3 = roberta_intermediate(x3, w3, b3, compute_dtype=jnp.bfloat16,
                                out_dtype=jnp.bfloat16)
    jax.block_until_ready(out3)
    ref3 = _reference(x3, w3, b3)
    assert out3.dtype == jnp.bfloat16
    assert jnp.allclose(out3.astype(jnp.float32), ref3, atol=3e-2, rtol=5e-2), \
        "mismatch (bf16 / ragged M)"

    print("KERNEL_OK")
</pallas_src>

<mosaic_0001>
module attributes {stable_mosaic.version = 11 : i64} {
  func.func @roberta_intermediate_kernel(%arg0: i32, %arg1: memref<16x32xf32, #tpu.memory_space<vmem>>, %arg2: memref<64x32xf32, #tpu.memory_space<vmem>>, %arg3: memref<1x64xf32, #tpu.memory_space<vmem>>, %arg4: memref<16x64xf32, #tpu.memory_space<vmem>>) attributes {dimension_semantics = [#tpu.dimension_semantics<parallel>], iteration_bounds = array<i64: 1>, scalar_prefetch = 0 : i64, scratch_operands = 0 : i64, tpu.core_type = #tpu.core_type<tc>, window_params = [{transform_indices = @transform_0, window_bounds = array<i64: 16, 32>}, {pipeline_mode = #tpu.pipeline_mode<synchronous>, transform_indices = @transform_1, window_bounds = array<i64: 64, 32>}, {pipeline_mode = #tpu.pipeline_mode<synchronous>, transform_indices = @transform_2, window_bounds = array<i64: 1, 64>}, {transform_indices = @transform_3, window_bounds = array<i64: 16, 64>}]} {
    %c0 = arith.constant 0 : index
    %c0_0 = arith.constant 0 : index
    %0 = vector.load %arg1[%c0, %c0_0] : memref<16x32xf32, #tpu.memory_space<vmem>>, vector<16x32xf32>
    %c0_1 = arith.constant 0 : index
    %c0_2 = arith.constant 0 : index
    %1 = vector.load %arg2[%c0_1, %c0_2] : memref<64x32xf32, #tpu.memory_space<vmem>>, vector<64x32xf32>
    %cst = arith.constant dense<0.000000e+00> : vector<16x64xf32>
    %2 = tpu.matmul %0, %1, %cst {dimension_numbers = #tpu.dot_dimension_numbers<[1], [1], [0], [0], [0, 0, 1, 0], [], []>} : vector<16x32xf32>, vector<64x32xf32>, vector<16x64xf32> -> vector<16x64xf32>
    %c0_3 = arith.constant 0 : index
    %c0_4 = arith.constant 0 : index
    %3 = vector.load %arg3[%c0_3, %c0_4] : memref<1x64xf32, #tpu.memory_space<vmem>>, vector<1x64xf32>
    %4 = vector.broadcast %3 : vector<1x64xf32> to vector<16x64xf32>
    %5 = arith.addf %2, %4 : vector<16x64xf32>
    %cst_5 = arith.constant 5.000000e-01 : f32
    %6 = vector.broadcast %cst_5 : f32 to vector<16x64xf32>
    %7 = arith.mulf %5, %6 : vector<16x64xf32>
    %cst_6 = arith.constant 1.41421354 : f32
    %8 = vector.broadcast %cst_6 : f32 to vector<16x64xf32>
    %9 = arith.divf %5, %8 : vector<16x64xf32>
    %10 = math.erf %9 : vector<16x64xf32>
    %cst_7 = arith.constant 1.000000e+00 : f32
    %11 = vector.broadcast %cst_7 : f32 to vector<16x64xf32>
    %12 = arith.addf %11, %10 : vector<16x64xf32>
    %13 = arith.mulf %7, %12 : vector<16x64xf32>
    %c0_8 = arith.constant 0 : index
    %c0_9 = arith.constant 0 : index
    %14 = vector.load %arg4[%c0_8, %c0_9] : memref<16x64xf32, #tpu.memory_space<vmem>>, vector<16x64xf32>
    tpu.vector_store %arg4[%c0_8, %c0_9], %13 {strides = array<i32>} : memref<16x64xf32, #tpu.memory_space<vmem>>, vector<16x64xf32>,
    return
  }
  func.func @transform_0(%arg0: i32) -> (i32, i32) {
    %c0_i32 = arith.constant 0 : i32
    %c0_i32_0 = arith.constant 0 : i32
    return %arg0, %c0_i32 : i32, i32
  }
  func.func @transform_1(%arg0: i32) -> (i32, i32) {
    %c0_i32 = arith.constant 0 : i32
    %c0_i32_0 = arith.constant 0 : i32
    %c0_i32_1 = arith.constant 0 : i32
    return %c0_i32, %c0_i32_0 : i32, i32
  }
  func.func @transform_2(%arg0: i32) -> (i32, i32) {
    %c0_i32 = arith.constant 0 : i32
    %c0_i32_0 = arith.constant 0 : i32
    %c0_i32_1 = arith.constant 0 : i32
    return %c0_i32, %c0_i32_0 : i32, i32
  }
  func.func @transform_3(%arg0: i32) -> (i32, i32) {
    %c0_i32 = arith.constant 0 : i32
    %c0_i32_0 = arith.constant 0 : i32
    return %arg0, %c0_i32 : i32, i32
  }
}

</mosaic_0001>

<bundles_post_ra>
// kernel: tpu_custom_call.1
= control target key start
LH: loop header
LB: loop body
LE: loop exit
PB: predicated region body
PF: predicated region fallthrough
CT: control target
= control target key end

     0   :  { %vm32_vm0 = vcmask 261120   ;;  %s355_s0 = inlined_call_operand.vmem [shape: f32[16,32], index: 0, kind: input, shape index: {}]   ;;  %s356_s1 = inlined_call_operand.vmem [shape: f32[64,32], index: 1, kind: input, shape index: {}]   ;;  %s357_s2 = inlined_call_operand.vmem [shape: f32[1,64], index: 2, kind: input, shape index: {}]   ;;  %s358_s3 = inlined_call_operand.hbm [shape: f32[16,64], index: 3, kind: output, shape index: {}]  }
   0x1   :  { %v17_v0 = vld [vmem:[%s356_s1] sm:$0xff]  ;;  %v18_v1 = vld [vmem:[%s356_s1 + $0x8] sm:$0xff]  ;;  %v19_v2 = vld [vmem:[%s356_s1 + $0x10] sm:$0xff] }
   0x2   :  { %v208_v3 = vpack.c.bf16 %v18_v1, %v17_v0  ;;  %vm297_vm1 = vmpackc.low %vm32_vm0, %vm32_vm0  ;;  %v20_v5 = vld [vmem:[%s356_s1 + $0x18] sm:$0xff]  ;;  %v15_v7 = vld [vmem:[%s355_s0] sm:$0xff] }
   0x3   :  { %v214_v6 = vpack.c.bf16 %v20_v5, %v19_v2 }
   0x4   :  { %210 = vmatprep.subr.msk.bf16.mxu0 %vm297_vm1, %v208_v3 }
   0x5   :  { %8 = vsyncpa [#allocation3], 0  ;;  %213 = vmatpush3.bf16.xpose.msk.msra.mxu0 %vm297_vm1, %v208_v3  ;;  %205 = vmatprep.mubr.msk.f32.mxu0 %vm32_vm0, %v15_v7  ;;  %v21_v8 = vld [vmem:[%s356_s1 + $0x20] sm:$0xff]  ;;  %v22_v9 = vld [vmem:[%s356_s1 + $0x28] sm:$0xff]  ;;  %vm149_vm2 = vcmask 523264  }
   0x6   :  { %216 = vmatprep.subr.msk.bf16.mxu0 %vm297_vm1, %v214_v6  ;;  %v220_v10 = vpack.c.bf16 %v22_v9, %v21_v8  ;;  %v23_v11 = vld [vmem:[%s356_s1 + $0x30] sm:$0xff]  ;;  %v24_v12 = vld [vmem:[%s356_s1 + $0x38] sm:$0xff]  ;;  %v16_v14 = vld [vmem:[%s355_s0 + $0x8] sm:$0xff]  ;;  %s263_s1 = smov [#allocation2]  }
   0x7   :  { %v226_v13 = vpack.c.bf16 %v24_v12, %v23_v11  ;;  %v168_v15 = vld [vmem:[%s357_s2] ss:$0 sm:$0xff]  ;;  %s157_s7 = sshll.u32 %s263_s1, 4  ;;  %s158_s7 = int_to_ptr.vmem [resolvable:$true] %s157_s7 }
   0x8   :  { %s239_s0 = scalar_lea.vmem %s158_s7, 256  ;;  %p244_p1 = scmp.lt.s32.totalorder %s158_s7, %s158_s7 }
   0x9   :  { %p240_p0 = scmp.ne.s32.totalorder %s158_s7, %s239_s0  ;;  %p245_p2 = scmp.lt.s32.totalorder %s239_s0, %s239_s0 }
   0xb   :  { %p246_p3 = por %p245_p2, %p244_p1 }
   0xd   :  { %219 = vmatpush3.bf16.xpose.msk.msra.mxu0 %vm297_vm1, %v214_v6  ;;  %p247_p4 = pnand %p246_p3, %p240_p0 }
   0xe   :  { %222 = vmatprep.subr.msk.bf16.mxu0 %vm297_vm1, %v220_v10 }
  0x15   :  { %225 = vmatpush3.bf16.xpose.msk.msra.mxu0 %vm297_vm1, %v220_v10 }
  0x16   :  { %228 = vmatprep.subr.msk.bf16.mxu0 %vm297_vm1, %v226_v13 }
  0x1d   :  { %231 = vmatpush3.bf16.xpose.msk.msra.mxu0 %vm297_vm1, %v226_v13 }
  0x24   :  { %206 = vmatmul.mubr.msk.f32.vlgmr.msra.gmra.mrb[0].mxu0 %vm32_vm0, %v16_v14 }
  0xf7   :  { %v207_v16 = vpop.f32.mrb[0].mxu0 }
  0xf8   :  { %v135_v17 = vadd.f32 %v207_v16, %v168_v15  ;;  %v129_v18 = vpop.f32.mrb[1].mxu0 }
  0xf9   :  { %v130_v19 = vadd.f32 %v168_v15, %v129_v18 }
  0xfa   :  { %v142_v20 = vmul.f32 0.70710677, %v135_v17  ;;  %v139_v24 = vmul.f32 0.5, %v135_v17 }
  0xfb   :  { %v141_v21 = vmul.f32 0.70710677, %v130_v19  ;;  %v138_v26 = vmul.f32 0.5, %v130_v19 }
  0xfc   :  { %235 = verf.f32 %v142_v20 }
  0xfd   :  { %237 = verf.f32 %v141_v21 }
 0x106   :  { %v236_v22 = vpop.eup %235 }
 0x107   :  { %v238_v23 = vpop.eup %237  ;;  %v146_v25 = vadd.f32 1.0, %v236_v22 }
 0x108   :  { %v145_v27 = vadd.f32 1.0, %v238_v23 }
 0x109   :  { %v148_v28 = vmul.f32 %v146_v25, %v139_v24 }
 0x10a   :  { %v147_v29 = vmul.f32 %v145_v27, %v138_v26 }
 0x10b   :  { %151 = vst.msk [vmem:[#allocation2 + $0x8] sm:$0xff] %vm149_vm2, %v148_v28 }
 0x10c   :  { %150 = vst.msk [vmem:[#allocation2] sm:$0xff] %vm149_vm2, %v147_v29 }
 0x10d   :  { %250 = shalt.err (!%p247_p4)
}
 0x10e   :  { %s251_s9 = scalar_lea.hbm %s358_s3, 256 }
 0x10f   :  { %p252_p5 = scmp.ne.s32.totalorder %s358_s3, %s251_s9  ;;  %p255_p6 = scmp.lt.u32.totalorder %s251_s9, %s358_s3 }
 0x111   :  { %p257_p7 = pnand %p255_p6, %p252_p5 }
 0x113   :  { %260 = shalt.err (!%p257_p7)
}
 0x114   :  { %s264_s14 = smov 128   ;;  %s265_s15 = smov 8  }
 0x115   :  { %163 = dma.vmem_to_hbm [thread:$0]  %s158_s7, 256, %s358_s3, [#allocation3], %s264_s14, %s264_s14, %s265_s15  }
 0x116   :  { %261 = dma.done.wait [#allocation3], 256  }
 0x117   :  { %262 = vsyncadd [#allocation3], 4294967040 }
 0x118   :  { %167 = vsyncpa [#allocation3], 1 }

</bundles_post_ra>
